<compile_context>
chip_gen: v6e
topology: v6e:2x2x1
jax: 0.10.0
libtpu: 0.0.40
codegen_flags: <defaults>
</compile_context>

<pallas_src>
import jax
import jax.numpy as jnp
from jax import lax
from jax.experimental import pallas as pl
from jax.experimental.pallas import tpu as pltpu

OUT_LANES = 128   # lane-dense packed prediction width
SPAN_COLS = 2     # columns 0:2  -> span logits
SAL_COL = 2       # column  2    -> saliency score


# ----------------------------------------------------------------------------
# Shared head math: cross-attention (vid -> txt) + packed span/saliency head.
# ----------------------------------------------------------------------------
def _attend_and_predict(txt_h, vid_h, batch, l_txt, l_vid,
                        w_q, w_kv, w_out, b_out, tmask3, vmask3):
    """txt_h: (B*Lt, H) f32, vid_h: (B*Lv, H) f32.
    w_q: (H,H) bf16 with 1/sqrt(H) folded in; w_kv: (H,2H) bf16 fused K/V;
    w_out: (H,128) bf16 packed span+saliency; b_out: (1,128) f32.
    tmask3: (B,1,Lt) f32 or None (None == all-valid); vmask3: (B,Lv,1) f32 or None."""
    hid = txt_h.shape[-1]

    q = jnp.dot(vid_h.astype(jnp.bfloat16), w_q,
                preferred_element_type=jnp.float32)               # (B*Lv, H)
    kv = jnp.dot(txt_h.astype(jnp.bfloat16), w_kv,
                 preferred_element_type=jnp.float32)              # (B*Lt, 2H)

    qb = q.reshape(batch, l_vid, hid).astype(jnp.bfloat16)
    kb = kv[:, :hid].reshape(batch, l_txt, hid).astype(jnp.bfloat16)
    vb = kv[:, hid:].reshape(batch, l_txt, hid).astype(jnp.bfloat16)

    # Batched q @ k^T contracting the feature axis directly (no transpose).
    scores = lax.dot_general(qb, kb, (((2,), (2,)), ((0,), (0,))),
                             preferred_element_type=jnp.float32)  # (B, Lv, Lt)
    if tmask3 is not None:
        scores = jnp.where(tmask3 > 0.0, scores, -1e30)

    m = jnp.max(scores, axis=-1, keepdims=True)
    p = jnp.exp(scores - m)                                       # masked -> exp(-big) == 0
    denom = jnp.maximum(jnp.sum(p, axis=-1, keepdims=True), 1e-20)
    attn = p * pl.reciprocal(denom, approx=True)                  # EUP reciprocal

    ctx = lax.dot_general(attn.astype(jnp.bfloat16), vb,
                          (((2,), (1,)), ((0,), (0,))),
                          preferred_element_type=jnp.float32)     # (B, Lv, H)
    fused = vid_h.reshape(batch, l_vid, hid) + ctx

    out = jnp.dot(fused.reshape(batch * l_vid, hid).astype(jnp.bfloat16), w_out,
                  preferred_element_type=jnp.float32) + b_out     # (B*Lv, 128)
    out3 = out.reshape(batch, l_vid, OUT_LANES)

    if vmask3 is not None:
        # Only the saliency column is video-masked (matches reference head).
        col = lax.broadcasted_iota(jnp.int32, out3.shape, 2)
        out3 = jnp.where(col == SAL_COL, out3 * vmask3, out3)
    return out3


# ----------------------------------------------------------------------------
# Fused kernel: backbone (linear+ReLU) + head, entire batch in one grid step.
# ----------------------------------------------------------------------------
def _fused_kernel(txt_ref, vid_ref,
                  w_txt_ref, b_txt_ref, w_vid_ref, b_vid_ref,
                  w_q_ref, w_kv_ref, w_out_ref, b_out_ref,
                  out_ref):
    batch, l_txt, d_txt = txt_ref.shape
    _, l_vid, d_vid = vid_ref.shape

    txt2 = txt_ref[...].reshape(batch * l_txt, d_txt).astype(jnp.bfloat16)
    vid2 = vid_ref[...].reshape(batch * l_vid, d_vid).astype(jnp.bfloat16)

    txt_h = jnp.maximum(
        jnp.dot(txt2, w_txt_ref[...], preferred_element_type=jnp.float32)
        + b_txt_ref[...], 0.0)                                    # (B*Lt, H) f32
    vid_h = jnp.maximum(
        jnp.dot(vid2, w_vid_ref[...], preferred_element_type=jnp.float32)
        + b_vid_ref[...], 0.0)                                    # (B*Lv, H) f32

    # Backbone masks are all-ones -> masked softmax / saliency mask are no-ops.
    out_ref[...] = _attend_and_predict(
        txt_h, vid_h, batch, l_txt, l_vid,
        w_q_ref[...], w_kv_ref[...], w_out_ref[...], b_out_ref[...],
        None, None)


def fused_forward(src_txt, src_vid, params):
    B, Lt, Dt = src_txt.shape
    _, Lv, Dv = src_vid.shape
    H = params["w_q"].shape[0]

    c2 = lambda i: (0, 0)
    c3 = lambda i: (0, 0, 0)
    return pl.pallas_call(
        _fused_kernel,
        out_shape=jax.ShapeDtypeStruct((B, Lv, OUT_LANES), jnp.float32),
        grid_spec=pltpu.PrefetchScalarGridSpec(
            num_scalar_prefetch=0,
            grid=(1,),
            in_specs=[
                pl.BlockSpec((B, Lt, Dt), c3),
                pl.BlockSpec((B, Lv, Dv), c3),
                pl.BlockSpec((Dt, H), c2),
                pl.BlockSpec((1, H), c2),
                pl.BlockSpec((Dv, H), c2),
                pl.BlockSpec((1, H), c2),
                pl.BlockSpec((H, H), c2),
                pl.BlockSpec((H, 2 * H), c2),
                pl.BlockSpec((H, OUT_LANES), c2),
                pl.BlockSpec((1, OUT_LANES), c2),
            ],
            out_specs=pl.BlockSpec((B, Lv, OUT_LANES), c3),
        ),
        compiler_params=pltpu.CompilerParams(
            dimension_semantics=("arbitrary",),
            vmem_limit_bytes=32 * 1024 * 1024),
    )(src_txt, src_vid,
      params["w_txt"], params["b_txt"], params["w_vid"], params["b_vid"],
      params["w_q"], params["w_kv"], params["w_out"], params["b_out"])


# ----------------------------------------------------------------------------
# Head-only kernel (skip_backbone=True path) with real padding masks.
# ----------------------------------------------------------------------------
def _head_kernel(txt_ref, vid_ref, tmask_ref, vmask_ref,
                 w_q_ref, w_kv_ref, w_out_ref, b_out_ref, out_ref):
    batch, l_txt, hid = txt_ref.shape
    _, l_vid, _ = vid_ref.shape
    txt_h = txt_ref[...].reshape(batch * l_txt, hid)
    vid_h = vid_ref[...].reshape(batch * l_vid, hid)
    out_ref[...] = _attend_and_predict(
        txt_h, vid_h, batch, l_txt, l_vid,
        w_q_ref[...], w_kv_ref[...], w_out_ref[...], b_out_ref[...],
        tmask_ref[...], vmask_ref[...])


def head_forward(txt_feat, txt_mask, vid_feat, vid_mask, params):
    B, Lt, H = txt_feat.shape
    _, Lv, _ = vid_feat.shape
    tmask3 = txt_mask.astype(jnp.float32).reshape(B, 1, Lt)
    vmask3 = vid_mask.astype(jnp.float32).reshape(B, Lv, 1)

    c2 = lambda i: (0, 0)
    c3 = lambda i: (0, 0, 0)
    return pl.pallas_call(
        _head_kernel,
        out_shape=jax.ShapeDtypeStruct((B, Lv, OUT_LANES), jnp.float32),
        grid_spec=pltpu.PrefetchScalarGridSpec(
            num_scalar_prefetch=0,
            grid=(1,),
            in_specs=[
                pl.BlockSpec((B, Lt, H), c3),
                pl.BlockSpec((B, Lv, H), c3),
                pl.BlockSpec((B, 1, Lt), c3),
                pl.BlockSpec((B, Lv, 1), c3),
                pl.BlockSpec((H, H), c2),
                pl.BlockSpec((H, 2 * H), c2),
                pl.BlockSpec((H, OUT_LANES), c2),
                pl.BlockSpec((1, OUT_LANES), c2),
            ],
            out_specs=pl.BlockSpec((B, Lv, OUT_LANES), c3),
        ),
        compiler_params=pltpu.CompilerParams(
            dimension_semantics=("arbitrary",),
            vmem_limit_bytes=32 * 1024 * 1024),
    )(txt_feat, vid_feat, tmask3, vmask3,
      params["w_q"], params["w_kv"], params["w_out"], params["b_out"])


# ----------------------------------------------------------------------------
# VideoGroundingModel.forward equivalent.
# ----------------------------------------------------------------------------
def video_grounding_forward(params, src_txt, src_vid,
                            src_txt_mask=None, src_vid_mask=None,
                            skip_backbone=False):
    # att_visualize / corr_visualize / epoch_i / idx are debug hooks only.
    if not skip_backbone:
        packed = fused_forward(src_txt, src_vid, params)
    else:
        B, Lt, _ = src_txt.shape
        _, Lv, _ = src_vid.shape
        if src_txt_mask is None:
            src_txt_mask = jnp.ones((B, Lt), jnp.float32)
        if src_vid_mask is None:
            src_vid_mask = jnp.ones((B, Lv), jnp.float32)
        packed = head_forward(src_txt, src_txt_mask, src_vid, src_vid_mask, params)
    return {"pred_spans": packed[..., :SPAN_COLS],
            "saliency_scores": packed[..., SAL_COL]}


def init_params(key, d_txt, d_vid, hidden):
    ks = jax.random.split(key, 7)
    s = 0.05
    w_txt = s * jax.random.normal(ks[0], (d_txt, hidden), jnp.float32)
    w_vid = s * jax.random.normal(ks[1], (d_vid, hidden), jnp.float32)
    w_q = s * jax.random.normal(ks[2], (hidden, hidden), jnp.float32)
    w_k = s * jax.random.normal(ks[3], (hidden, hidden), jnp.float32)
    w_v = s * jax.random.normal(ks[4], (hidden, hidden), jnp.float32)
    w_span = s * jax.random.normal(ks[5], (hidden, SPAN_COLS), jnp.float32)
    w_sal = s * jax.random.normal(ks[6], (hidden, 1), jnp.float32)

    # One-time param transforms (review items): fold attention scale into w_q,
    # fuse K/V, pack span+saliency into one lane-dense weight.
    w_q = w_q / jnp.sqrt(jnp.float32(hidden))
    w_kv = jnp.concatenate([w_k, w_v], axis=1)                   # (H, 2H)
    w_out = jnp.zeros((hidden, OUT_LANES), jnp.float32)
    w_out = w_out.at[:, 0:SPAN_COLS].set(w_span)
    w_out = w_out.at[:, SAL_COL:SAL_COL + 1].set(w_sal)
    b_out = jnp.zeros((1, OUT_LANES), jnp.float32)               # span/sal biases are zero

    bf = jnp.bfloat16
    return {
        "w_txt": w_txt.astype(bf), "b_txt": jnp.zeros((1, hidden), jnp.float32),
        "w_vid": w_vid.astype(bf), "b_vid": jnp.zeros((1, hidden), jnp.float32),
        "w_q": w_q.astype(bf), "w_kv": w_kv.astype(bf),
        "w_out": w_out.astype(bf), "b_out": b_out,
    }


if __name__ == "__main__":
    B, Lt, Lv = 2, 8, 16
    D_TXT, D_VID, HIDDEN = 32, 32, 32

    key = jax.random.PRNGKey(0)
    k_txt, k_vid, k_par, k_txt2, k_vid2 = jax.random.split(key, 5)
    src_txt = jax.random.normal(k_txt, (B, Lt, D_TXT), jnp.float32)
    src_vid = jax.random.normal(k_vid, (B, Lv, D_VID), jnp.float32)
    params = init_params(k_par, D_TXT, D_VID, HIDDEN)

    # Path 1: backbone + head fused into a single Pallas kernel.
    out = video_grounding_forward(params, src_txt, src_vid, skip_backbone=False)
    jax.block_until_ready(out)
    assert out["pred_spans"].shape == (B, Lv, 2)
    assert out["saliency_scores"].shape == (B, Lv)
    assert bool(jnp.all(jnp.isfinite(out["pred_spans"])))
    assert bool(jnp.all(jnp.isfinite(out["saliency_scores"])))

    # Path 2: skip_backbone=True with real padding masks (masked head kernel).
    txt_h = jax.random.normal(k_txt2, (B, Lt, HIDDEN), jnp.float32)
    vid_h = jax.random.normal(k_vid2, (B, Lv, HIDDEN), jnp.float32)
    txt_mask = jnp.concatenate(
        [jnp.ones((B, Lt - 2), jnp.float32), jnp.zeros((B, 2), jnp.float32)], axis=1)
    vid_mask = jnp.concatenate(
        [jnp.ones((B, Lv - 4), jnp.float32), jnp.zeros((B, 4), jnp.float32)], axis=1)
    out2 = video_grounding_forward(params, txt_h, vid_h, txt_mask, vid_mask,
                                   skip_backbone=True)
    jax.block_until_ready(out2)
    assert out2["pred_spans"].shape == (B, Lv, 2)
    assert bool(jnp.all(jnp.isfinite(out2["pred_spans"])))
    assert bool(jnp.all(jnp.isfinite(out2["saliency_scores"])))
    # Padded video positions must have zero saliency.
    assert bool(jnp.all(out2["saliency_scores"][:, Lv - 4:] == 0.0))

    print("KERNEL_OK")
</pallas_src>

<mosaic_0001>
module attributes {stable_mosaic.version = 11 : i64} {
  func.func @_fused_kernel(%arg0: i32, %arg1: memref<2x8x32xf32, #tpu.memory_space<vmem>>, %arg2: memref<2x16x32xf32, #tpu.memory_space<vmem>>, %arg3: memref<32x32xbf16, #tpu.memory_space<vmem>>, %arg4: memref<1x32xf32, #tpu.memory_space<vmem>>, %arg5: memref<32x32xbf16, #tpu.memory_space<vmem>>, %arg6: memref<1x32xf32, #tpu.memory_space<vmem>>, %arg7: memref<32x32xbf16, #tpu.memory_space<vmem>>, %arg8: memref<32x64xbf16, #tpu.memory_space<vmem>>, %arg9: memref<32x128xbf16, #tpu.memory_space<vmem>>, %arg10: memref<1x128xf32, #tpu.memory_space<vmem>>, %arg11: memref<2x16x128xf32, #tpu.memory_space<vmem>>) attributes {dimension_semantics = [#tpu.dimension_semantics<arbitrary>], iteration_bounds = array<i64: 1>, scalar_prefetch = 0 : i64, scratch_operands = 0 : i64, tpu.core_type = #tpu.core_type<tc>, window_params = [{pipeline_mode = #tpu.pipeline_mode<synchronous>, transform_indices = @transform_0, window_bounds = array<i64: 2, 8, 32>}, {pipeline_mode = #tpu.pipeline_mode<synchronous>, transform_indices = @transform_1, window_bounds = array<i64: 2, 16, 32>}, {pipeline_mode = #tpu.pipeline_mode<synchronous>, transform_indices = @transform_2, window_bounds = array<i64: 32, 32>}, {pipeline_mode = #tpu.pipeline_mode<synchronous>, transform_indices = @transform_3, window_bounds = array<i64: 1, 32>}, {pipeline_mode = #tpu.pipeline_mode<synchronous>, transform_indices = @transform_4, window_bounds = array<i64: 32, 32>}, {pipeline_mode = #tpu.pipeline_mode<synchronous>, transform_indices = @transform_5, window_bounds = array<i64: 1, 32>}, {pipeline_mode = #tpu.pipeline_mode<synchronous>, transform_indices = @transform_6, window_bounds = array<i64: 32, 32>}, {pipeline_mode = #tpu.pipeline_mode<synchronous>, transform_indices = @transform_7, window_bounds = array<i64: 32, 64>}, {pipeline_mode = #tpu.pipeline_mode<synchronous>, transform_indices = @transform_8, window_bounds = array<i64: 32, 128>}, {pipeline_mode = #tpu.pipeline_mode<synchronous>, transform_indices = @transform_9, window_bounds = array<i64: 1, 128>}, {pipeline_mode = #tpu.pipeline_mode<synchronous>, transform_indices = @transform_10, window_bounds = array<i64: 2, 16, 128>}]} {
    %c0 = arith.constant 0 : index
    %c0_0 = arith.constant 0 : index
    %c0_1 = arith.constant 0 : index
    %0 = vector.load %arg1[%c0, %c0_0, %c0_1] : memref<2x8x32xf32, #tpu.memory_space<vmem>>, vector<2x8x32xf32>
    %1 = vector.shape_cast %0 : vector<2x8x32xf32> to vector<16x32xf32>
    %2 = arith.truncf %1 : vector<16x32xf32> to vector<16x32xbf16>
    %c0_2 = arith.constant 0 : index
    %c0_3 = arith.constant 0 : index
    %c0_4 = arith.constant 0 : index
    %3 = vector.load %arg2[%c0_2, %c0_3, %c0_4] : memref<2x16x32xf32, #tpu.memory_space<vmem>>, vector<2x16x32xf32>
    %4 = vector.shape_cast %3 : vector<2x16x32xf32> to vector<32x32xf32>
    %5 = arith.truncf %4 : vector<32x32xf32> to vector<32x32xbf16>
    %c0_5 = arith.constant 0 : index
    %c0_6 = arith.constant 0 : index
    %6 = vector.load %arg3[%c0_5, %c0_6] : memref<32x32xbf16, #tpu.memory_space<vmem>>, vector<32x32xbf16>
    %cst = arith.constant dense<0.000000e+00> : vector<16x32xf32>
    %7 = tpu.matmul %2, %6, %cst {dimension_numbers = #tpu.dot_dimension_numbers<[1], [0], [0], [1], [0, 0, 1, 1], [], []>} : vector<16x32xbf16>, vector<32x32xbf16>, vector<16x32xf32> -> vector<16x32xf32>
    %c0_7 = arith.constant 0 : index
    %c0_8 = arith.constant 0 : index
    %8 = vector.load %arg4[%c0_7, %c0_8] : memref<1x32xf32, #tpu.memory_space<vmem>>, vector<1x32xf32>
    %9 = vector.broadcast %8 : vector<1x32xf32> to vector<16x32xf32>
    %10 = arith.addf %7, %9 : vector<16x32xf32>
    %cst_9 = arith.constant 0.000000e+00 : f32
    %11 = vector.broadcast %cst_9 : f32 to vector<16x32xf32>
    %12 = arith.maximumf %10, %11 : vector<16x32xf32>
    %c0_10 = arith.constant 0 : index
    %c0_11 = arith.constant 0 : index
    %13 = vector.load %arg5[%c0_10, %c0_11] : memref<32x32xbf16, #tpu.memory_space<vmem>>, vector<32x32xbf16>
    %cst_12 = arith.constant dense<0.000000e+00> : vector<32x32xf32>
    %14 = tpu.matmul %5, %13, %cst_12 {dimension_numbers = #tpu.dot_dimension_numbers<[1], [0], [0], [1], [0, 0, 1, 1], [], []>} : vector<32x32xbf16>, vector<32x32xbf16>, vector<32x32xf32> -> vector<32x32xf32>
    %c0_13 = arith.constant 0 : index
    %c0_14 = arith.constant 0 : index
    %15 = vector.load %arg6[%c0_13, %c0_14] : memref<1x32xf32, #tpu.memory_space<vmem>>, vector<1x32xf32>
    %16 = vector.broadcast %15 : vector<1x32xf32> to vector<32x32xf32>
    %17 = arith.addf %14, %16 : vector<32x32xf32>
    %cst_15 = arith.constant 0.000000e+00 : f32
    %18 = vector.broadcast %cst_15 : f32 to vector<32x32xf32>
    %19 = arith.maximumf %17, %18 : vector<32x32xf32>
    %c0_16 = arith.constant 0 : index
    %c0_17 = arith.constant 0 : index
    %20 = vector.load %arg7[%c0_16, %c0_17] : memref<32x32xbf16, #tpu.memory_space<vmem>>, vector<32x32xbf16>
    %c0_18 = arith.constant 0 : index
    %c0_19 = arith.constant 0 : index
    %21 = vector.load %arg8[%c0_18, %c0_19] : memref<32x64xbf16, #tpu.memory_space<vmem>>, vector<32x64xbf16>
    %c0_20 = arith.constant 0 : index
    %c0_21 = arith.constant 0 : index
    %22 = vector.load %arg9[%c0_20, %c0_21] : memref<32x128xbf16, #tpu.memory_space<vmem>>, vector<32x128xbf16>
    %c0_22 = arith.constant 0 : index
    %c0_23 = arith.constant 0 : index
    %23 = vector.load %arg10[%c0_22, %c0_23] : memref<1x128xf32, #tpu.memory_space<vmem>>, vector<1x128xf32>
    %24 = arith.truncf %19 : vector<32x32xf32> to vector<32x32xbf16>
    %cst_24 = arith.constant dense<0.000000e+00> : vector<32x32xf32>
    %25 = tpu.matmul %24, %20, %cst_24 {dimension_numbers = #tpu.dot_dimension_numbers<[1], [0], [0], [1], [0, 0, 1, 1], [], []>} : vector<32x32xbf16>, vector<32x32xbf16>, vector<32x32xf32> -> vector<32x32xf32>
    %26 = arith.truncf %12 : vector<16x32xf32> to vector<16x32xbf16>
    %cst_25 = arith.constant dense<0.000000e+00> : vector<16x64xf32>
    %27 = tpu.matmul %26, %21, %cst_25 {dimension_numbers = #tpu.dot_dimension_numbers<[1], [0], [0], [1], [0, 0, 1, 1], [], []>} : vector<16x32xbf16>, vector<32x64xbf16>, vector<16x64xf32> -> vector<16x64xf32>
    %28 = vector.shape_cast %25 : vector<32x32xf32> to vector<2x16x32xf32>
    %29 = arith.truncf %28 : vector<2x16x32xf32> to vector<2x16x32xbf16>
    %30 = vector.extract_strided_slice %27 {offsets = [0, 0], sizes = [16, 32], strides = [1, 1]} : vector<16x64xf32> to vector<16x32xf32>
    %31 = vector.shape_cast %30 : vector<16x32xf32> to vector<2x8x32xf32>
    %32 = arith.truncf %31 : vector<2x8x32xf32> to vector<2x8x32xbf16>
    %33 = vector.extract_strided_slice %27 {offsets = [0, 32], sizes = [16, 32], strides = [1, 1]} : vector<16x64xf32> to vector<16x32xf32>
    %34 = vector.shape_cast %33 : vector<16x32xf32> to vector<2x8x32xf32>
    %35 = arith.truncf %34 : vector<2x8x32xf32> to vector<2x8x32xbf16>
    %cst_26 = arith.constant dense<0.000000e+00> : vector<2x16x8xf32>
    %36 = tpu.matmul %29, %32, %cst_26 {dimension_numbers = #tpu.dot_dimension_numbers<[2], [2], [1], [1], [0, 0, 0, 1, 1, 1], [0], [0]>} : vector<2x16x32xbf16>, vector<2x8x32xbf16>, vector<2x16x8xf32> -> vector<2x16x8xf32>
    %cst_27 = arith.constant dense<0xFF800000> : vector<2x16xf32>
    %37 = vector.multi_reduction <maximumf>, %36, %cst_27 [2] : vector<2x16x8xf32> to vector<2x16xf32>
    %38 = vector.shape_cast %37 : vector<2x16xf32> to vector<2x16x1xf32>
    %39 = vector.broadcast %38 : vector<2x16x1xf32> to vector<2x16x8xf32>
    %40 = arith.subf %36, %39 : vector<2x16x8xf32>
    %41 = math.exp %40 : vector<2x16x8xf32>
    %cst_28 = arith.constant dense<0.000000e+00> : vector<2x16xf32>
    %42 = vector.multi_reduction <add>, %41, %cst_28 [2] : vector<2x16x8xf32> to vector<2x16xf32>
    %43 = vector.shape_cast %42 : vector<2x16xf32> to vector<2x16x1xf32>
    %cst_29 = arith.constant 9.99999968E-21 : f32
    %44 = vector.broadcast %cst_29 : f32 to vector<2x16x1xf32>
    %45 = arith.maximumf %43, %44 : vector<2x16x1xf32>
    %46 = tpu.reciprocal %45 {approx = true} : vector<2x16x1xf32> -> vector<2x16x1xf32>
    %47 = vector.broadcast %46 : vector<2x16x1xf32> to vector<2x16x8xf32>
    %48 = arith.mulf %41, %47 : vector<2x16x8xf32>
    %49 = arith.truncf %48 : vector<2x16x8xf32> to vector<2x16x8xbf16>
    %cst_30 = arith.constant dense<0.000000e+00> : vector<2x16x32xf32>
    %50 = tpu.matmul %49, %35, %cst_30 {dimension_numbers = #tpu.dot_dimension_numbers<[2], [1], [1], [2], [0, 0, 0, 1, 1, 2], [0], [0]>} : vector<2x16x8xbf16>, vector<2x8x32xbf16>, vector<2x16x32xf32> -> vector<2x16x32xf32>
    %51 = vector.shape_cast %19 : vector<32x32xf32> to vector<2x16x32xf32>
    %52 = arith.addf %51, %50 : vector<2x16x32xf32>
    %53 = vector.shape_cast %52 : vector<2x16x32xf32> to vector<32x32xf32>
    %54 = arith.truncf %53 : vector<32x32xf32> to vector<32x32xbf16>
    %cst_31 = arith.constant dense<0.000000e+00> : vector<32x128xf32>
    %55 = tpu.matmul %54, %22, %cst_31 {dimension_numbers = #tpu.dot_dimension_numbers<[1], [0], [0], [1], [0, 0, 1, 1], [], []>} : vector<32x32xbf16>, vector<32x128xbf16>, vector<32x128xf32> -> vector<32x128xf32>
    %56 = vector.broadcast %23 : vector<1x128xf32> to vector<32x128xf32>
    %57 = arith.addf %55, %56 : vector<32x128xf32>
    %58 = vector.shape_cast %57 : vector<32x128xf32> to vector<2x16x128xf32>
    %c0_32 = arith.constant 0 : index
    %c0_33 = arith.constant 0 : index
    %c0_34 = arith.constant 0 : index
    %59 = vector.load %arg11[%c0_32, %c0_33, %c0_34] : memref<2x16x128xf32, #tpu.memory_space<vmem>>, vector<2x16x128xf32>
    tpu.vector_store %arg11[%c0_32, %c0_33, %c0_34], %58 {strides = array<i32>} : memref<2x16x128xf32, #tpu.memory_space<vmem>>, vector<2x16x128xf32>,
    return
  }
  func.func @transform_0(%arg0: i32) -> (i32, i32, i32) {
    %c0_i32 = arith.constant 0 : i32
    %c0_i32_0 = arith.constant 0 : i32
    %c0_i32_1 = arith.constant 0 : i32
    %c0_i32_2 = arith.constant 0 : i32
    return %c0_i32, %c0_i32_0, %c0_i32_1 : i32, i32, i32
  }
  func.func @transform_1(%arg0: i32) -> (i32, i32, i32) {
    %c0_i32 = arith.constant 0 : i32
    %c0_i32_0 = arith.constant 0 : i32
    %c0_i32_1 = arith.constant 0 : i32
    %c0_i32_2 = arith.constant 0 : i32
    return %c0_i32, %c0_i32_0, %c0_i32_1 : i32, i32, i32
  }
  func.func @transform_2(%arg0: i32) -> (i32, i32) {
    %c0_i32 = arith.constant 0 : i32
    %c0_i32_0 = arith.constant 0 : i32
    %c0_i32_1 = arith.constant 0 : i32
    return %c0_i32, %c0_i32_0 : i32, i32
  }
  func.func @transform_3(%arg0: i32) -> (i32, i32) {
    %c0_i32 = arith.constant 0 : i32
    %c0_i32_0 = arith.constant 0 : i32
    %c0_i32_1 = arith.constant 0 : i32
    return %c0_i32, %c0_i32_0 : i32, i32
  }
  func.func @transform_4(%arg0: i32) -> (i32, i32) {
    %c0_i32 = arith.constant 0 : i32
    %c0_i32_0 = arith.constant 0 : i32
    %c0_i32_1 = arith.constant 0 : i32
    return %c0_i32, %c0_i32_0 : i32, i32
  }
  func.func @transform_5(%arg0: i32) -> (i32, i32) {
    %c0_i32 = arith.constant 0 : i32
    %c0_i32_0 = arith.constant 0 : i32
    %c0_i32_1 = arith.constant 0 : i32
    return %c0_i32, %c0_i32_0 : i32, i32
  }
  func.func @transform_6(%arg0: i32) -> (i32, i32) {
    %c0_i32 = arith.constant 0 : i32
    %c0_i32_0 = arith.constant 0 : i32
    %c0_i32_1 = arith.constant 0 : i32
    return %c0_i32, %c0_i32_0 : i32, i32
  }
  func.func @transform_7(%arg0: i32) -> (i32, i32) {
    %c0_i32 = arith.constant 0 : i32
    %c0_i32_0 = arith.constant 0 : i32
    %c0_i32_1 = arith.constant 0 : i32
    return %c0_i32, %c0_i32_0 : i32, i32
  }
  func.func @transform_8(%arg0: i32) -> (i32, i32) {
    %c0_i32 = arith.constant 0 : i32
    %c0_i32_0 = arith.constant 0 : i32
    %c0_i32_1 = arith.constant 0 : i32
    return %c0_i32, %c0_i32_0 : i32, i32
  }
  func.func @transform_9(%arg0: i32) -> (i32, i32) {
    %c0_i32 = arith.constant 0 : i32
    %c0_i32_0 = arith.constant 0 : i32
    %c0_i32_1 = arith.constant 0 : i32
    return %c0_i32, %c0_i32_0 : i32, i32
  }
  func.func @transform_10(%arg0: i32) -> (i32, i32, i32) {
    %c0_i32 = arith.constant 0 : i32
    %c0_i32_0 = arith.constant 0 : i32
    %c0_i32_1 = arith.constant 0 : i32
    %c0_i32_2 = arith.constant 0 : i32
    return %c0_i32, %c0_i32_0, %c0_i32_1 : i32, i32, i32
  }
}

</mosaic_0001>

<bundles_post_ra>
// kernel: tpu_custom_call.1
= control target key start
LH: loop header
LB: loop body
LE: loop exit
PB: predicated region body
PF: predicated region fallthrough
CT: control target
= control target key end

     0   :  { %15 = vsyncpa [#allocation3], 0  ;;  %s1312_s0 = inlined_call_operand.hbm [shape: f32[2,8,32], index: 0, kind: input, shape index: {}]   ;;  %s1313_s1 = inlined_call_operand.hbm [shape: f32[2,16,32], index: 1, kind: input, shape index: {}]   ;;  %s1314_s2 = inlined_call_operand.hbm [shape: bf16[32,32], index: 2, kind: input, shape index: {}]   ;;  %s1315_s3 = inlined_call_operand.vmem [shape: f32[1,32], index: 3, kind: input, shape index: {}]   ;;  %s1316_s4 = inlined_call_operand.hbm [shape: bf16[32,32], index: 4, kind: input, shape index: {}]   ;;  %s1317_s5 = inlined_call_operand.vmem [shape: f32[1,32], index: 5, kind: input, shape index: {}]   ;;  %s1318_s6 = inlined_call_operand.hbm [shape: bf16[32,32], index: 6, kind: input, shape index: {}]   ;;  %s1319_s7 = inlined_call_operand.hbm [shape: bf16[32,64], index: 7, kind: input, shape index: {}]   ;;  %s1320_s8 = inlined_call_operand.hbm [shape: bf16[32,128], index: 8, kind: input, shape index: {}]   ;;  %s1321_s9 = inlined_call_operand.vmem [shape: f32[1,128], index: 9, kind: input, shape index: {}]   ;;  %s1322_s10 = inlined_call_operand.hbm [shape: f32[2,16,128], index: 10, kind: output, shape index: {}]  }
   0x1   :  { %16 = vsyncpa [#allocation6], 0 }
   0x2   :  { %17 = vsyncpa [#allocation9], 0 }
   0x3   :  { %18 = vsyncpa [#allocation12], 0 }
   0x4   :  { %19 = vsyncpa [#allocation4], 0  ;;  %s1111_s13 = smov [#allocation5]  }
   0x5   :  { %s37_s14 = sshll.u32 %s1111_s13, 4  ;;  %s38_s14 = int_to_ptr.vmem [resolvable:$true] %s37_s14 }
   0x6   :  { %s949_s15 = scalar_lea.vmem %s38_s14, 512  ;;  %p954_p1 = scmp.lt.s32.totalorder %s38_s14, %s38_s14 }
   0x7   :  { %p950_p0 = scmp.ne.s32.totalorder %s38_s14, %s949_s15  ;;  %p955_p2 = scmp.lt.s32.totalorder %s949_s15, %s949_s15 }
   0x9   :  { %p956_p3 = por %p955_p2, %p954_p1 }
   0xb   :  { %p957_p4 = pnand %p956_p3, %p950_p0 }
   0xd   :  { %960 = shalt.err (!%p957_p4)
}
   0xe   :  { %s1112_s16 = smov 128   ;;  %s1113_s17 = smov 8  }
   0xf   :  { %43 = dma.hbm_to_vmem [thread:$0]  %s1313_s1, 512, %s38_s14, [#allocation6], %s1112_s16, %s1112_s16, %s1113_s17  }
  0x10   :  { %s1114_s20 = smov [#allocation8]   ;;  %s1115_s22 = smov [#allocation11]  }
  0x11   :  { %s63_s21 = sshll.u32 %s1114_s20, 4  ;;  %s89_s23 = sshll.u32 %s1115_s22, 4  ;;  %s64_s21 = int_to_ptr.vmem [resolvable:$true] %s63_s21  ;;  %s90_s23 = int_to_ptr.vmem [resolvable:$true] %s89_s23 }
  0x12   :  { %s969_s24 = scalar_lea.vmem %s64_s21, 256  ;;  %p974_p6 = scmp.lt.s32.totalorder %s64_s21, %s64_s21 }
  0x13   :  { %p970_p5 = scmp.ne.s32.totalorder %s64_s21, %s969_s24  ;;  %p975_p7 = scmp.lt.s32.totalorder %s969_s24, %s969_s24 }
  0x15   :  { %p976_p8 = por %p975_p7, %p974_p6 }
  0x17   :  { %p977_p9 = pnand %p976_p8, %p970_p5 }
  0x19   :  { %980 = shalt.err (!%p977_p9)
}
  0x1a   :  { %s1116_s25 = smov 64   ;;  %s1117_s26 = smov 4  }
  0x1b   :  { %69 = dma.hbm_to_vmem [thread:$0]  %s1316_s4, 256, %s64_s21, [#allocation9], %s1116_s25, %s1116_s25, %s1117_s26  }
  0x1c   :  { %s989_s1 = scalar_lea.vmem %s90_s23, 256  ;;  %p994_p11 = scmp.lt.s32.totalorder %s90_s23, %s90_s23 }
  0x1d   :  { %p990_p10 = scmp.ne.s32.totalorder %s90_s23, %s989_s1  ;;  %p995_p12 = scmp.lt.s32.totalorder %s989_s1, %s989_s1 }
  0x1f   :  { %p996_p13 = por %p995_p12, %p994_p11 }
  0x21   :  { %p997_p0 = pnand %p996_p13, %p990_p10 }
  0x23   :  { %1000 = shalt.err (!%p997_p0)
}
  0x24   :  { %95 = dma.hbm_to_vmem [thread:$0]  %s1319_s7, 256, %s90_s23, [#allocation12], %s1116_s25, %s1116_s25, %s1117_s26  }
  0x25   :  { %s1118_s11 = smov [#allocation2]   ;;  %s1119_s13 = smov [#allocation7]  }
  0x26   :  { %s25_s12 = sshll.u32 %s1118_s11, 4  ;;  %s49_s4 = sshll.u32 %s1119_s13, 4  ;;  %s26_s12 = int_to_ptr.vmem [resolvable:$true] %s25_s12  ;;  %s50_s4 = int_to_ptr.vmem [resolvable:$true] %s49_s4 }
  0x27   :  { %s1009_s14 = scalar_lea.vmem %s26_s12, 256  ;;  %p1014_p2 = scmp.lt.s32.totalorder %s26_s12, %s26_s12 }
  0x28   :  { %p1010_p1 = scmp.ne.s32.totalorder %s26_s12, %s1009_s14  ;;  %p1015_p3 = scmp.lt.s32.totalorder %s1009_s14, %s1009_s14 }
  0x2a   :  { %p1016_p4 = por %p1015_p3, %p1014_p2 }
  0x2c   :  { %p1017_p5 = pnand %p1016_p4, %p1010_p1 }
  0x2e   :  { %1020 = shalt.err (!%p1017_p5)
}
  0x2f   :  { %31 = dma.hbm_to_vmem [thread:$0]  %s1312_s0, 256, %s26_s12, [#allocation3], %s1112_s16, %s1112_s16, %s1113_s17  }
  0x30   :  { %s1029_s7 = scalar_lea.vmem %s50_s4, 256  ;;  %p1034_p7 = scmp.lt.s32.totalorder %s50_s4, %s50_s4 }
  0x31   :  { %p1030_p6 = scmp.ne.s32.totalorder %s50_s4, %s1029_s7  ;;  %p1035_p8 = scmp.lt.s32.totalorder %s1029_s7, %s1029_s7 }
  0x33   :  { %p1036_p9 = por %p1035_p8, %p1034_p7 }
  0x35   :  { %p1037_p10 = pnand %p1036_p9, %p1030_p6 }
  0x37   :  { %1040 = shalt.err (!%p1037_p10)
}
  0x38   :  { %55 = dma.hbm_to_vmem [thread:$0]  %s1314_s2, 256, %s50_s4, [#allocation6], %s1116_s25, %s1116_s25, %s1117_s26  }
  0x39   :  { %s1120_s21 = smov [#allocation10]   ;;  %s1121_s23 = smov [#allocation13]  }
  0x3a   :  { %s77_s22 = sshll.u32 %s1120_s21, 4  ;;  %s101_s0 = sshll.u32 %s1121_s23, 4  ;;  %s78_s22 = int_to_ptr.vmem [resolvable:$true] %s77_s22  ;;  %s102_s0 = int_to_ptr.vmem [resolvable:$true] %s101_s0 }
  0x3b   :  { %s1049_s24 = scalar_lea.vmem %s78_s22, 256  ;;  %p1054_p12 = scmp.lt.s32.totalorder %s78_s22, %s78_s22 }
  0x3c   :  { %p1050_p11 = scmp.ne.s32.totalorder %s78_s22, %s1049_s24  ;;  %p1055_p13 = scmp.lt.s32.totalorder %s1049_s24, %s1049_s24 }
  0x3e   :  { %p1056_p0 = por %p1055_p13, %p1054_p12 }
  0x40   :  { %p1057_p1 = pnand %p1056_p0, %p1050_p11 }
  0x42   :  { %1060 = shalt.err (!%p1057_p1)
}
  0x43   :  { %83 = dma.hbm_to_vmem [thread:$0]  %s1318_s6, 256, %s78_s22, [#allocation9], %s1116_s25, %s1116_s25, %s1117_s26  }
  0x44   :  { %s1069_s2 = scalar_lea.vmem %s102_s0, 256  ;;  %p1074_p3 = scmp.lt.s32.totalorder %s102_s0, %s102_s0 }
  0x45   :  { %p1070_p2 = scmp.ne.s32.totalorder %s102_s0, %s1069_s2  ;;  %p1075_p4 = scmp.lt.s32.totalorder %s1069_s2, %s1069_s2 }
  0x47   :  { %p1076_p5 = por %p1075_p4, %p1074_p3 }
  0x49   :  { %p1077_p6 = pnand %p1076_p5, %p1070_p2 }
  0x4b   :  { %1080 = shalt.err (!%p1077_p6)
}
  0x4c   :  { %107 = dma.hbm_to_vmem [thread:$0]  %s1320_s8, 256, %s102_s0, [#allocation12], %s1116_s25, %s1116_s25, %s1117_s26  }
  0x4d   :  { %1101 = dma.done.wait [#allocation3], 256  }
  0x4e   :  { %1102 = vsyncadd [#allocation3], 4294967040 }
  0x4f   :  { %1103 = dma.done.wait [#allocation6], 768  }
  0x50   :  { %1104 = vsyncadd [#allocation6], 4294966528 }
  0x51   :  { %1105 = dma.done.wait [#allocation9], 512  }
  0x52   :  { %1106 = vsyncadd [#allocation9], 4294966784 }
  0x53   :  { %1107 = dma.done.wait [#allocation12], 512  }
  0x54   :  { %1108 = vsyncadd [#allocation12], 4294966784  ;;  %v1122_v0 = vmov 0.0   ;;  %vm1123_vm0 = vmmov 0   ;;  %v915_v1 = vld [vmem:[#allocation7 + $0x8] sm:$0xff]   ;;  %v916_v2 = vld [vmem:[#allocation8 + $0x8] sm:$0xff]  }
  0x55   :  { %836 = vmatprep.subr.bf16.mxu0 %v1122_v0  ;;  %840 = vmatprep.mubr.msk.bf16.mxu0 %vm1123_vm0, %v1122_v0  ;;  %v917_v3 = vld [vmem:[#allocation7] sm:$0xff]   ;;  %v918_v4 = vld [vmem:[#allocation8] sm:$0xff]   ;;  %v133_v6 = vld [vmem:[#allocation2 + $0x8] sm:$0xff]  ;;  %vm164_vm1 = vcmask 261120   ;;  %vm530_vm2 = vcmask 64512   ;;  %vm587_vm3 = vcmask 1043456  }
  0x56   :  { %837 = vmatpush3.bf16.msra.mxu0 %v915_v1  ;;  %844 = vmatprep.subr.bf16.mxu1 %v916_v2  ;;  %v132_v5 = vld [vmem:[#allocation2] sm:$0xff]  ;;  %v135_v7 = vld [vmem:[#allocation5] sm:$0xff]  ;;  %v136_v9 = vld [vmem:[#allocation5 + $0x8] sm:$0xff]  ;;  %s1125_s11 = smov [#allocation14]  }
  0x57   :  { %838 = vmatprep.subr.bf16.mxu0 %v1122_v0  ;;  %845 = vmatpush3.bf16.msra.mxu1 %v916_v2  ;;  %v134_v8 = vpack.c.bf16 %v133_v6, %v132_v5  ;;  %v137_v10 = vld [vmem:[#allocation5 + $0x10] sm:$0xff]  ;;  %v138_v11 = vld [vmem:[#allocation5 + $0x18] sm:$0xff]  ;;  %v139_v12 = vpack.c.bf16 %v136_v9, %v135_v7  ;;  %v920_v15 = vld [vmem:[#allocation10 + $0x8] sm:$0xff]   ;;  %s770_s12 = sshll.u32 %s1125_s11, 4  ;;  %s771_s12 = int_to_ptr.vmem [resolvable:$true] %s770_s12 }
  0x58   :  { %846 = vmatprep.subr.bf16.mxu1 %v918_v4  ;;  %v140_v13 = vpack.c.bf16 %v138_v11, %v137_v10  ;;  %v919_v14 = vld [vmem:[#allocation11 + $0x8] sm:$0xff]   ;;  %v921_v16 = vld [vmem:[#allocation11] sm:$0xff]   ;;  %v922_v17 = vld [vmem:[#allocation10] sm:$0xff]   ;;  %s1081_s13 = scalar_lea.vmem %s771_s12, 512  ;;  %p1086_p8 = scmp.lt.s32.totalorder %s771_s12, %s771_s12 }
  0x59   :  { %848 = vmatprep.mubr.msk.bf16.mxu1 %vm164_vm1, %v139_v12  ;;  %v785_v18 = vld [vmem:[%s1315_s3] ss:$0 sm:$0xff]  ;;  %s1124_s3 = smov 96   ;;  %p1082_p7 = scmp.ne.s32.totalorder %s771_s12, %s1081_s13 }
  0x5a   :  { %839 = vmatpush3.bf16.msra.mxu0 %v917_v3  ;;  %v789_v25 = vld [vmem:[%s1317_s5] ss:$0 sm:$0xff]  ;;  %p1087_p9 = scmp.lt.s32.totalorder %s1081_s13, %s1081_s13 }
  0x5b   :  { %847 = vmatpush3.bf16.msra.mxu1 %v918_v4  ;;  %852 = vmatprep.subr.bf16.mxu0 %v920_v15 }
  0x5c   :  { %860 = vmatprep.subr.bf16.mxu1 %v1122_v0  ;;  %p1088_p10 = por %p1087_p9, %p1086_p8 }
  0x5d   :  { %841 = vmatmul.mubr.msk.bf16.vlgmr.msra.gmra.mxu0 %vm164_vm1, %v134_v8 }
  0x5e   :  { %849 = vmatmul.mubr.msk.bf16.vlgmr.msra.gmra.mxu1 %vm164_vm1, %v140_v13  ;;  %853 = vmatpush3.bf16.msra.mxu0 %v920_v15  ;;  %p1089_p11 = pnand %p1088_p10, %p1082_p7 }
  0x5f   :  { %864 = vmatprep.mubr.msk.bf16.mxu1 %vm1123_vm0, %v1122_v0  ;;  %861 = vmatpush3.bf16.msra.mxu1 %v919_v14 }
  0x60   :  { %862 = vmatprep.subr.bf16.mxu1 %v1122_v0  ;;  %854 = vmatprep.subr.bf16.mxu0 %v922_v17 }
  0x62   :  { %855 = vmatpush3.bf16.msra.mxu0 %v922_v17 }
  0x63   :  { %863 = vmatpush3.bf16.msra.mxu1 %v921_v16  ;;  %868 = vmatprep.subr.bf16.mxu0 %v1122_v0 }
  0x64   :  { %874 = vmatprep.subr.bf16.mxu1 %v1122_v0 }
 0x11d   :  { %v202_v19 = vpop.f32.mrf.mxu0 }
 0x11e   :  { %v850_v20 = vpop.f32.mrf.mxu1  ;;  %v203_v22 = vadd.f32 %v785_v18, %v202_v19 }
 0x11f   :  { %v842_v21 = vpop.f32.mrf.mxu0  ;;  %v1246_v33 = vadd.f32 %v850_v20, %v789_v25 }
 0x120   :  { %v274_v23 = vpop.f32.mrf.mxu1  ;;  %v209_v29 = vmax.f32 %v203_v22, 0.0 }
 0x121   :  { %v205_v24 = vpop.f32.mrf.mxu0  ;;  %v1242_v30 = vadd.f32 %v789_v25, %v274_v23  ;;  %v291_v40 = vmax.f32 %v1246_v33, 0.0 }
 0x122   :  { %v206_v26 = vadd.f32 %v785_v18, %v205_v24  ;;  %v851_v27 = vpop.f32.mrf.mxu1 }
 0x123   :  { %v843_v28 = vpop.f32.mrf.mxu0  ;;  %v1244_v32 = vadd.f32 %v851_v27, %v789_v25  ;;  %v289_v38 = vmax.f32 %v1242_v30, 0.0  ;;  %v805_v30 = vld [vmem:[%s1321_s9] ss:$0 sm:$0xff] }
 0x124   :  { %v210_v31 = vmax.f32 %v206_v26, 0.0  ;;  %v277_v34 = vpop.f32.mrf.mxu1 }
 0x125   :  { %v1248_v36 = vadd.f32 %v789_v25, %v277_v34  ;;  %v292_v37 = vmax.f32 %v1244_v32, 0.0 }
 0x126   :  { %v375_v35 = vpack.c.bf16 %v210_v31, %v209_v29 }
 0x127   :  { %v290_v39 = vmax.f32 %v1248_v36, 0.0  ;;  %v307_v42 = vpack.c.bf16 %v292_v37, %v291_v40 }
 0x128   :  { %865 = vmatmul.mubr.msk.bf16.vlgmr.msra.gmra.mxu1 %vm164_vm1, %v375_v35 }
 0x129   :  { %876 = vmatprep.mubr.msk.bf16.mxu1 %vm1123_vm0, %v1122_v0  ;;  %v306_v41 = vpack.c.bf16 %v290_v39, %v289_v38 }
 0x12b   :  { %856 = vmatprep.mubr.msk.bf16.mxu0 %vm164_vm1, %v306_v41 }
 0x12c   :  { %857 = vmatmul.mubr.msk.bf16.vlgmr.msra.gmra.mxu0 %vm164_vm1, %v307_v42 }
 0x12d   :  { %870 = vmatprep.mubr.msk.bf16.mxu0 %vm1123_vm0, %v1122_v0 }
 0x1e8   :  { %v425_v43 = vpop.f32.mrf.mxu1 }
 0x1e9   :  { %v1269_v44 = vpack.c.bf16 %v425_v43, %v425_v43 }
 0x1ea   :  { %v866_v45 = vpop.f32.mrf.mxu1 }
 0x1eb   :  { %v440_v46 = vsel %vm164_vm1, %v1269_v44, 0 }
 0x1ec   :  { %v428_v47 = vpop.f32.mrf.mxu1  ;;  %869 = vmatpush3.bf16.xpose.msra.mxu0 %v440_v46  ;;  %v858_v48 = vpop.f32.mrf.mxu0 }
 0x1ed   :  { %v435_v49 = vpack.c.bf16 %v428_v47, %v428_v47  ;;  %880 = vmatprep.subr.bf16.mxu0 %v1122_v0 }
 0x1ee   :  { %v867_v50 = vpop.f32.mrf.mxu1  ;;  %v360_v52 = vpop.f32.mrf.mxu0 }
 0x1ef   :  { %v487_v51 = vsel %vm164_vm1, %v435_v49, 0 }
 0x1f0   :  { %875 = vmatpush3.bf16.xpose.msra.mxu1 %v487_v51  ;;  %v859_v53 = vpop.f32.mrf.mxu0 }
 0x1f1   :  { %886 = vmatprep.subr.bf16.mxu1 %v1122_v0  ;;  %v433_v56 = vpack.c.bf16 %v859_v53, %v858_v48 }
 0x1f2   :  { %v363_v54 = vpop.f32.mrf.mxu0 }
 0x1f3   :  { %v432_v55 = vpack.c.bf16 %v363_v54, %v360_v52 }
 0x1f5   :  { %871 = vmatmul.mubr.msk.bf16.vlgmr.msra.gmra.mxu0 %vm164_vm1, %v432_v55  ;;  %v923_v55 = vld [vmem:[#allocation13 + $0x8] sm:$0xff]  }
 0x1f6   :  { %882 = vmatprep.mubr.msk.bf16.mxu0 %vm1123_vm0, %v1122_v0 }
 0x1f7   :  { %877 = vmatmul.mubr.msk.bf16.vlgmr.msra.gmra.mxu1 %vm164_vm1, %v433_v56  ;;  %v924_v56 = vld [vmem:[#allocation13] sm:$0xff]  }
 0x1f8   :  { %888 = vmatprep.mubr.msk.bf16.mxu1 %vm1123_vm0, %v1122_v0 }
 0x2b5   :  { %v476_v57 = vpop.f32.mrf.mxu0 }
 0x2b6   :  { %v531_v59 = vsel %vm530_vm2, %v476_v57, -inf }
 0x2b7   :  { %v523_v58 = vpop.f32.mrf.mxu1  ;;  %532 = vmax.xlane.f32.xlu0 %v531_v59  ;;  %v872_v60 = vpop.f32.mrf.mxu0 }
 0x2b8   :  { %v537_v61 = vsel %vm530_vm2, %v523_v58, -inf }
 0x2b9   :  { %538 = vmax.xlane.f32.xlu1 %v537_v61  ;;  %v878_v62 = vpop.f32.mrf.mxu1  ;;  %v479_v63 = vpop.f32.mrf.mxu0 }
 0x2ba   :  { %v534_v2 = vsel %vm530_vm2, %v479_v63, -inf }
 0x2bb   :  { %v526_v1 = vpop.f32.mrf.mxu1  ;;  %535 = vmax.xlane.f32.xlu0 %v534_v2  ;;  %v873_v3 = vpop.f32.mrf.mxu0 }
 0x2bc   :  { %v540_v4 = vsel %vm530_vm2, %v526_v1, -inf }
 0x2bd   :  { %541 = vmax.xlane.f32.xlu1 %v540_v4  ;;  %v879_v0 = vpop.f32.mrf.mxu1 }
 0x340   :  { %v533_v5 = vpop.xlane.xlu0 %532 }
 0x341   :  { %v543_v6 = vsub.f32 %v476_v57, %v533_v5 }
 0x342   :  { %v539_v7 = vpop.xlane.xlu1 %538 }
 0x343   :  { %v545_v8 = vsub.f32 %v523_v58, %v539_v7  ;;  %v547_v9 = vmul.f32 1.442695, %v543_v6 }
 0x344   :  { %v536_v11 = vpop.xlane.xlu0 %535 }
 0x345   :  { %v551_v10 = vmul.f32 1.442695, %v545_v8  ;;  %925 = vpow2.f32 %v547_v9  ;;  %v544_v12 = vsub.f32 %v479_v63, %v536_v11 }
 0x346   :  { %v542_v13 = vpop.xlane.xlu1 %541 }
 0x347   :  { %v546_v14 = vsub.f32 %v526_v1, %v542_v13  ;;  %927 = vpow2.f32 %v551_v10  ;;  %v549_v15 = vmul.f32 1.442695, %v544_v12 }
 0x349   :  { %v553_v16 = vmul.f32 1.442695, %v546_v14  ;;  %929 = vpow2.f32 %v549_v15 }
 0x34b   :  { %931 = vpow2.f32 %v553_v16 }
 0x352   :  { %v926_v17 = vpop.eup %925 }
 0x353   :  { %v555_v18 = vsel %vm530_vm2, %v926_v17, 0.0 }
 0x354   :  { %v928_v19 = vpop.eup %927  ;;  %556 = vadd.xlane.f32.xlu0 %v555_v18 }
 0x355   :  { %v561_v21 = vsel %vm530_vm2, %v928_v19, 0.0 }
 0x356   :  { %v930_v20 = vpop.eup %929 }
 0x357   :  { %v558_v22 = vsel %vm530_vm2, %v930_v20, 0.0 }
 0x358   :  { %v932_v23 = vpop.eup %931  ;;  %562 = vadd.xlane.f32.xlu0 %v561_v21  ;;  %559 = vadd.xlane.f32.xlu1 %v558_v22 }
 0x359   :  { %v564_v24 = vsel %vm530_vm2, %v932_v23, 0.0 }
 0x35c   :  { %565 = vadd.xlane.f32.xlu1 %v564_v24 }
 0x36d   :  { %633 = vrot.lane.b32.xlu1 %v435_v49, %s1124_s3 }
 0x36e   :  { %582 = vrot.lane.b32.xlu0 %v1269_v44, %s1124_s3 }
 0x3dd   :  { %v557_v25 = vpop.xlane.xlu0 %556 }
 0x3de   :  { %v567_v26 = vmax.f32 %v557_v25, 1e-20 }
 0x3e0   :  { %933 = vrcp.f32 %v567_v26 }
 0x3e1   :  { %v560_v27 = vpop.xlane.xlu1 %559  ;;  %v563_v28 = vpop.xlane.xlu0 %562 }
 0x3e2   :  { %v568_v29 = vmax.f32 %v560_v27, 1e-20  ;;  %v569_v31 = vmax.f32 %v563_v28, 1e-20 }
 0x3e4   :  { %935 = vrcp.f32 %v568_v29 }
 0x3e5   :  { %v566_v34 = vpop.xlane.xlu1 %565  ;;  %v583_v35 = vpop.permute.xlu0 %582  ;;  %937 = vrcp.f32 %v569_v31 }
 0x3e6   :  { %v570_v41 = vmax.f32 %v566_v34, 1e-20  ;;  %v589_v42 = vsel %vm587_vm3, %v583_v35, 0 }
 0x3e7   :  { %881 = vmatpush3.bf16.msra.mxu0 %v589_v42 }
 0x3e8   :  { %939 = vrcp.f32 %v570_v41  ;;  %892 = vmatprep.subr.bf16.mxu0 %v923_v55 }
 0x3e9   :  { %v634_v43 = vpop.permute.xlu1 %633 }
 0x3ea   :  { %v639_v45 = vsel %vm587_vm3, %v634_v43, 0 }
 0x3eb   :  { %887 = vmatpush3.bf16.msra.mxu1 %v639_v45 }
 0x3ed   :  { %v934_v44 = vpop.eup %933 }
 0x3ee   :  { %v575_v47 = vmul.f32 %v934_v44, %v926_v17 }
 0x3f1   :  { %v936_v46 = vpop.eup %935 }
 0x3f2   :  { %v576_v48 = vmul.f32 %v936_v46, %v930_v20  ;;  %v938_v49 = vpop.eup %937 }
 0x3f3   :  { %v577_v52 = vmul.f32 %v938_v49, %v928_v19 }
 0x3f4   :  { %v579_v50 = vpack.c.bf16 %v576_v48, %v575_v47 }
 0x3f5   :  { %v940_v51 = vpop.eup %939 }
 0x3f6   :  { %883 = vmatmul.mubr.msk.bf16.vlgmr.msra.gmra.mxu0 %vm530_vm2, %v579_v50  ;;  %v578_v53 = vmul.f32 %v940_v51, %v932_v23 }
 0x3f7   :  { %893 = vmatpush3.bf16.msra.mxu0 %v923_v55 }
 0x3f8   :  { %v580_v54 = vpack.c.bf16 %v578_v53, %v577_v52  ;;  %894 = vmatprep.subr.bf16.mxu0 %v924_v56 }
 0x3fa   :  { %889 = vmatmul.mubr.msk.bf16.vlgmr.msra.gmra.mxu1 %vm530_vm2, %v580_v54 }
 0x3fb   :  { %895 = vmatpush3.bf16.msra.mxu0 %v924_v56 }
 0x4b6   :  { %v625_v57 = vpop.f32.mrf.mxu0 }
 0x4b7   :  { %v682_v61 = vadd.f32 %v625_v57, %v289_v38 }
 0x4b8   :  { %v884_v58 = vpop.f32.mrf.mxu0 }
 0x4ba   :  { %v628_v59 = vpop.f32.mrf.mxu0  ;;  %v675_v60 = vpop.f32.mrf.mxu1 }
 0x4bb   :  { %v683_v62 = vadd.f32 %v628_v59, %v290_v39  ;;  %v684_v4 = vadd.f32 %v675_v60, %v291_v40 }
 0x4bc   :  { %v885_v63 = vpop.f32.mrf.mxu0  ;;  %v890_v1 = vpop.f32.mrf.mxu1 }
 0x4bd   :  { %v686_v2 = vpack.c.bf16 %v683_v62, %v682_v61 }
 0x4be   :  { %v678_v3 = vpop.f32.mrf.mxu1 }
 0x4bf   :  { %v685_v0 = vadd.f32 %v678_v3, %v292_v37  ;;  %896 = vmatprep.mubr.msk.bf16.mxu0 %vm164_vm1, %v686_v2 }
 0x4c0   :  { %v891_v5 = vpop.f32.mrf.mxu1 }
 0x4c1   :  { %v687_v6 = vpack.c.bf16 %v685_v0, %v684_v4 }
 0x4c3   :  { %897 = vmatmul.mubr.msk.bf16.vlgmr.msra.gmra.mxu0 %vm164_vm1, %v687_v6 }
 0x583   :  { %v898_v36 = vpop.f32.mrf.mxu0 }
 0x584   :  { %v755_v38 = vadd.f32 %v898_v36, %v805_v30 }
 0x585   :  { %v746_v39 = vpop.f32.mrf.mxu0 }
 0x586   :  { %763 = vst [vmem:[#allocation14 + $0x10] sm:$0xff] %v755_v38  ;;  %v747_v7 = vadd.f32 %v805_v30, %v746_v39 }
 0x587   :  { %v899_v33 = vpop.f32.mrf.mxu0 }
 0x588   :  { %761 = vst [vmem:[#allocation14] sm:$0xff] %v747_v7  ;;  %v758_v32 = vadd.f32 %v899_v33, %v805_v30 }
 0x589   :  { %v749_v37 = vpop.f32.mrf.mxu0 }
 0x58a   :  { %764 = vst [vmem:[#allocation14 + $0x18] sm:$0xff] %v758_v32  ;;  %v750_v40 = vadd.f32 %v805_v30, %v749_v37 }
 0x58c   :  { %762 = vst [vmem:[#allocation14 + $0x8] sm:$0xff] %v750_v40 }
 0x58d   :  { %1092 = shalt.err (!%p1089_p11)
}
 0x58e   :  { %776 = dma.vmem_to_hbm [thread:$0]  %s771_s12, 512, %s1322_s10, [#allocation4], %s1112_s16, %s1112_s16, %s1113_s17  }
 0x58f   :  { %1109 = dma.done.wait [#allocation4], 512  }
 0x590   :  { %1110 = vsyncadd [#allocation4], 4294966784 }
 0x591   :  { %780 = vsyncpa [#allocation3], 1 }
 0x592   :  { %781 = vsyncpa [#allocation6], 1 }
 0x593   :  { %782 = vsyncpa [#allocation9], 1 }
 0x594   :  { %783 = vsyncpa [#allocation12], 1 }
 0x595   :  { %784 = vsyncpa [#allocation4], 1 }

</bundles_post_ra>
